<compile_context>
chip_gen: v5e
topology: v5e:2x2
jax: 0.10.0
libtpu: 0.0.40
codegen_flags: <defaults>
</compile_context>

<pallas_src>
import functools

import jax
import jax.numpy as jnp
from jax.experimental import pallas as pl
from jax.experimental.pallas import tpu as pltpu

_LANE = 128
_SUBLANE = 8


def _round_up(x, m):
    return ((x + m - 1) // m) * m


def _act_fn(activation):
    if activation == "tanh":
        return jnp.tanh
    if activation == "sigmoid":
        return lambda v: jax.nn.sigmoid(v - 4.0)
    raise NotImplementedError("Unknown activation function", activation)


# ----------------------------------------------------------------------------
# Conditional gating kernel: per-row MLP gate + elementwise multiply.
# ----------------------------------------------------------------------------
def _xa_gate_cond_kernel(x_ref, w1_ref, w2_ref, *out_refs, activation):
    out_ref = out_refs[0]
    gate_ref = out_refs[1] if len(out_refs) > 1 else None

    x = x_ref[...]                                                  # (tm, D)
    # MXU matmuls in the weight dtype (bf16 weights supported), f32 accumulate.
    h = jnp.dot(x.astype(w1_ref.dtype), w1_ref[...],
                preferred_element_type=jnp.float32)
    h = jnp.maximum(h, 0.0)
    g = jnp.dot(h.astype(w2_ref.dtype), w2_ref[...],
                preferred_element_type=jnp.float32)
    if activation == "tanh":
        g = jnp.tanh(g)
    else:  # 'sigmoid'
        g = jax.nn.sigmoid(g - 4.0)
    # f32 math, single cast on store (no redundant round trips for f32 inputs).
    out_ref[...] = (x * g).astype(out_ref.dtype)
    if gate_ref is not None:
        gate_ref[...] = g.astype(gate_ref.dtype)


def xa_gate_conditional(x, w1, w2, *, activation="tanh", tm=256,
                        return_gate=True, weight_dtype=None,
                        vmem_budget_bytes=24 * 1024 * 1024):
    """x: [B, S, D]; w1: [D, H]; w2: [H, D] (matmul-ready layouts).
    Returns (x*gate, gate), both [B, S, D]; or just x*gate if return_gate=False."""
    B, S, D = x.shape
    M = B * S
    x2 = x.reshape(M, D)

    # --- weight prep: optional bf16 cast + pad hidden dim to a lane multiple ---
    if weight_dtype is not None:
        w1 = w1.astype(weight_dtype)
        w2 = w2.astype(weight_dtype)
    H = w1.shape[1]
    H_pad = _round_up(max(H, _LANE), _LANE)
    if H_pad != H:
        # Zero-padded columns/rows are mathematically inert (ReLU(0)=0, 0*W2=0).
        w1 = jnp.pad(w1, ((0, 0), (0, H_pad - H)))
        w2 = jnp.pad(w2, ((0, H_pad - H), (0, 0)))

    # --- tile selection: big row tiles, capped by a conservative VMEM budget ---
    n_out = 2 if return_gate else 1
    w_bytes = w1.size * w1.dtype.itemsize + w2.size * w2.dtype.itemsize
    avail = vmem_budget_bytes - 2 * w_bytes                 # weights double-buffered
    per_row = (1 + n_out) * 2 * D * x.dtype.itemsize        # x + outputs, 2 buffers each
    if avail > 0:
        cap = max(_SUBLANE, (avail // per_row) // _SUBLANE * _SUBLANE)
    else:
        cap = _SUBLANE
    tm = max(_SUBLANE, min(tm, cap, _round_up(M, _SUBLANE)))

    # --- ragged M: pad rows to a multiple of the tile (zero rows are harmless) ---
    M_pad = _round_up(M, tm)
    if M_pad != M:
        x2 = jnp.pad(x2, ((0, M_pad - M), (0, 0)))

    out_shape = jax.ShapeDtypeStruct((M_pad, D), x.dtype)
    out_specs = pl.BlockSpec((tm, D), lambda i: (i, 0))
    if return_gate:
        out_shape = (out_shape, jax.ShapeDtypeStruct((M_pad, D), x.dtype))
        out_specs = [out_specs, pl.BlockSpec((tm, D), lambda i: (i, 0))]

    kernel = functools.partial(_xa_gate_cond_kernel, activation=activation)
    result = pl.pallas_call(
        kernel,
        out_shape=out_shape,
        grid_spec=pltpu.PrefetchScalarGridSpec(
            num_scalar_prefetch=0,
            grid=(M_pad // tm,),
            in_specs=[
                pl.BlockSpec((tm, D), lambda i: (i, 0)),     # x row-tile
                pl.BlockSpec(w1.shape, lambda i: (0, 0)),    # W1 resident (constant block)
                pl.BlockSpec(w2.shape, lambda i: (0, 0)),    # W2 resident (constant block)
            ],
            out_specs=out_specs,
        ),
        compiler_params=pltpu.CompilerParams(
            dimension_semantics=("parallel",),               # megacore sharding on v7x
        ),
    )(x2, w1, w2)

    if return_gate:
        out2, gate2 = result
        return out2[:M].reshape(B, S, D), gate2[:M].reshape(B, S, D)
    return result[:M].reshape(B, S, D)


# ----------------------------------------------------------------------------
# Non-conditional gating kernel: scalar alpha (SMEM) -> act -> elementwise mul.
# The tensor is flattened and re-tiled into a lane-dense [rows, 512] slab so
# stores are unmasked full-lane vst regardless of the model's D.
# ----------------------------------------------------------------------------
def _xa_gate_scalar_kernel(alpha_ref, x_ref, out_ref, *, activation):
    a = alpha_ref[0, 0]
    if activation == "tanh":
        g = jnp.tanh(a)
    else:
        g = jax.nn.sigmoid(a - 4.0)
    out_ref[...] = (x_ref[...] * g).astype(out_ref.dtype)


def xa_gate_scalar(x, alpha, *, activation="tanh", block_rows=256, lane_width=512):
    """x: [B, S, D]; alpha: scalar param (PyTorch shape (1,1,1)).
    Returns (x*gate, gate) with gate of shape (1, 1, 1)."""
    orig_shape = x.shape
    N = x.size
    xf = x.reshape(-1)

    lw = lane_width
    rows = -(-N // lw)
    br = max(_SUBLANE, min(block_rows, _round_up(rows, _SUBLANE)))
    rows_pad = _round_up(rows, br)
    pad = rows_pad * lw - N
    if pad:
        xf = jnp.pad(xf, (0, pad))
    x2 = xf.reshape(rows_pad, lw)

    alpha_smem = jnp.reshape(alpha, (1, 1)).astype(jnp.float32)
    kernel = functools.partial(_xa_gate_scalar_kernel, activation=activation)
    out2 = pl.pallas_call(
        kernel,
        out_shape=jax.ShapeDtypeStruct((rows_pad, lw), x.dtype),
        grid_spec=pltpu.PrefetchScalarGridSpec(
            num_scalar_prefetch=0,
            grid=(rows_pad // br,),
            in_specs=[
                pl.BlockSpec(memory_space=pltpu.SMEM),       # alpha scalar
                pl.BlockSpec((br, lw), lambda i: (i, 0)),    # lane-dense x tile
            ],
            out_specs=pl.BlockSpec((br, lw), lambda i: (i, 0)),
        ),
        compiler_params=pltpu.CompilerParams(
            dimension_semantics=("parallel",),
        ),
    )(alpha_smem, x2)

    out = out2.reshape(-1)[:N].reshape(orig_shape)
    # gate_weight itself is a trivial scalar op (glue), PyTorch shape (1,1,1).
    gate_weight = _act_fn(activation)(jnp.asarray(alpha)).reshape(1, 1, 1)
    return out, gate_weight


# ----------------------------------------------------------------------------
# Pure-JAX references (for correctness check).
# ----------------------------------------------------------------------------
def ref_conditional(x, w1, w2, activation="tanh"):
    act = _act_fn(activation)
    h = jnp.maximum(
        jnp.dot(x.astype(w1.dtype), w1, preferred_element_type=jnp.float32), 0.0)
    g = act(jnp.dot(h.astype(w2.dtype), w2, preferred_element_type=jnp.float32))
    return (x * g).astype(x.dtype), g.astype(x.dtype)


def ref_scalar(x, alpha, activation="tanh"):
    g = _act_fn(activation)(jnp.asarray(alpha)).reshape(1, 1, 1)
    return x * g, g


if __name__ == "__main__":
    key = jax.random.PRNGKey(0)
    B, S, D = 2, 8, 32
    H = int(0.125 * D)  # hidden_dims_factor * dims = 4

    kx, k1, k2 = jax.random.split(key, 3)
    x = jax.random.normal(kx, (B, S, D), dtype=jnp.float32)
    # PyTorch Linear(D,H) weight is (H,D); we store the matmul-ready transposes:
    # w1: [D, H], w2: [H, D].
    w1 = jax.random.normal(k1, (D, H), dtype=jnp.float32) * (1.0 / jnp.sqrt(D))
    w2 = jax.random.normal(k2, (H, D), dtype=jnp.float32) * (1.0 / jnp.sqrt(H))
    alpha = jnp.float32(0.0)  # torch.full((1,1,1), 0.0)

    # --- conditional gating, tanh (f32 weights, tight tolerance) ---
    out_c, gate_c = xa_gate_conditional(x, w1, w2, activation="tanh")
    jax.block_until_ready((out_c, gate_c))
    ref_out_c, ref_gate_c = ref_conditional(x, w1, w2, "tanh")
    assert out_c.shape == (B, S, D) and gate_c.shape == (B, S, D)
    assert jnp.allclose(out_c, ref_out_c, atol=1e-5, rtol=1e-5)
    assert jnp.allclose(gate_c, ref_gate_c, atol=1e-5, rtol=1e-5)

    # --- conditional gating, sigmoid(x-4) ---
    out_s, gate_s = xa_gate_conditional(x, w1, w2, activation="sigmoid")
    jax.block_until_ready((out_s, gate_s))
    ref_out_s, ref_gate_s = ref_conditional(x, w1, w2, "sigmoid")
    assert jnp.allclose(out_s, ref_out_s, atol=1e-5, rtol=1e-5)
    assert jnp.allclose(gate_s, ref_gate_s, atol=1e-5, rtol=1e-5)

    # --- conditional gating, bf16 weights on the MXU (f32 accumulate) ---
    out_b, gate_b = xa_gate_conditional(x, w1, w2, activation="tanh",
                                        weight_dtype=jnp.bfloat16)
    jax.block_until_ready((out_b, gate_b))
    ref_out_b, _ = ref_conditional(x, w1.astype(jnp.bfloat16),
                                   w2.astype(jnp.bfloat16), "tanh")
    assert jnp.allclose(out_b, ref_out_b, atol=2e-2, rtol=2e-2)

    # --- conditional gating, ragged M (B*S not tile-aligned) + gate dropped ---
    xr = jax.random.normal(jax.random.PRNGKey(1), (3, 7, D), dtype=jnp.float32)
    out_r = xa_gate_conditional(xr, w1, w2, activation="tanh", return_gate=False)
    jax.block_until_ready(out_r)
    ref_out_r, _ = ref_conditional(xr, w1, w2, "tanh")
    assert jnp.allclose(out_r, ref_out_r, atol=1e-5, rtol=1e-5)

    # --- non-conditional (scalar alpha) gating, tanh ---
    out_p, gate_p = xa_gate_scalar(x, alpha, activation="tanh")
    jax.block_until_ready((out_p, gate_p))
    ref_out_p, ref_gate_p = ref_scalar(x, alpha, "tanh")
    assert gate_p.shape == (1, 1, 1)
    assert jnp.allclose(out_p, ref_out_p, atol=1e-6)
    assert jnp.allclose(gate_p, ref_gate_p, atol=1e-6)

    print("KERNEL_OK")
</pallas_src>

<mosaic_0001>
module attributes {stable_mosaic.version = 11 : i64} {
  func.func @_xa_gate_cond_kernel(%arg0: i32, %arg1: memref<16x32xf32, #tpu.memory_space<vmem>>, %arg2: memref<32x128xf32, #tpu.memory_space<vmem>>, %arg3: memref<128x32xf32, #tpu.memory_space<vmem>>, %arg4: memref<16x32xf32, #tpu.memory_space<vmem>>, %arg5: memref<16x32xf32, #tpu.memory_space<vmem>>) attributes {dimension_semantics = [#tpu.dimension_semantics<parallel>], iteration_bounds = array<i64: 1>, scalar_prefetch = 0 : i64, scratch_operands = 0 : i64, tpu.core_type = #tpu.core_type<tc>, window_params = [{transform_indices = @transform_0, window_bounds = array<i64: 16, 32>}, {pipeline_mode = #tpu.pipeline_mode<synchronous>, transform_indices = @transform_1, window_bounds = array<i64: 32, 128>}, {pipeline_mode = #tpu.pipeline_mode<synchronous>, transform_indices = @transform_2, window_bounds = array<i64: 128, 32>}, {transform_indices = @transform_3, window_bounds = array<i64: 16, 32>}, {transform_indices = @transform_4, window_bounds = array<i64: 16, 32>}]} {
    %c0 = arith.constant 0 : index
    %c0_0 = arith.constant 0 : index
    %0 = vector.load %arg1[%c0, %c0_0] : memref<16x32xf32, #tpu.memory_space<vmem>>, vector<16x32xf32>
    %c0_1 = arith.constant 0 : index
    %c0_2 = arith.constant 0 : index
    %1 = vector.load %arg2[%c0_1, %c0_2] : memref<32x128xf32, #tpu.memory_space<vmem>>, vector<32x128xf32>
    %cst = arith.constant dense<0.000000e+00> : vector<16x128xf32>
    %2 = tpu.matmul %0, %1, %cst {dimension_numbers = #tpu.dot_dimension_numbers<[1], [0], [0], [1], [0, 0, 1, 1], [], []>} : vector<16x32xf32>, vector<32x128xf32>, vector<16x128xf32> -> vector<16x128xf32>
    %cst_3 = arith.constant 0.000000e+00 : f32
    %3 = vector.broadcast %cst_3 : f32 to vector<16x128xf32>
    %4 = arith.maximumf %2, %3 : vector<16x128xf32>
    %c0_4 = arith.constant 0 : index
    %c0_5 = arith.constant 0 : index
    %5 = vector.load %arg3[%c0_4, %c0_5] : memref<128x32xf32, #tpu.memory_space<vmem>>, vector<128x32xf32>
    %cst_6 = arith.constant dense<0.000000e+00> : vector<16x32xf32>
    %6 = tpu.matmul %4, %5, %cst_6 {dimension_numbers = #tpu.dot_dimension_numbers<[1], [0], [0], [1], [0, 0, 1, 1], [], []>} : vector<16x128xf32>, vector<128x32xf32>, vector<16x32xf32> -> vector<16x32xf32>
    %7 = math.tanh %6 : vector<16x32xf32>
    %8 = arith.mulf %0, %7 : vector<16x32xf32>
    %c0_7 = arith.constant 0 : index
    %c0_8 = arith.constant 0 : index
    %9 = vector.load %arg4[%c0_7, %c0_8] : memref<16x32xf32, #tpu.memory_space<vmem>>, vector<16x32xf32>
    tpu.vector_store %arg4[%c0_7, %c0_8], %8 {strides = array<i32>} : memref<16x32xf32, #tpu.memory_space<vmem>>, vector<16x32xf32>,
    %c0_9 = arith.constant 0 : index
    %c0_10 = arith.constant 0 : index
    %10 = vector.load %arg5[%c0_9, %c0_10] : memref<16x32xf32, #tpu.memory_space<vmem>>, vector<16x32xf32>
    tpu.vector_store %arg5[%c0_9, %c0_10], %7 {strides = array<i32>} : memref<16x32xf32, #tpu.memory_space<vmem>>, vector<16x32xf32>,
    return
  }
  func.func @transform_0(%arg0: i32) -> (i32, i32) {
    %c0_i32 = arith.constant 0 : i32
    %c0_i32_0 = arith.constant 0 : i32
    return %arg0, %c0_i32 : i32, i32
  }
  func.func @transform_1(%arg0: i32) -> (i32, i32) {
    %c0_i32 = arith.constant 0 : i32
    %c0_i32_0 = arith.constant 0 : i32
    %c0_i32_1 = arith.constant 0 : i32
    return %c0_i32, %c0_i32_0 : i32, i32
  }
  func.func @transform_2(%arg0: i32) -> (i32, i32) {
    %c0_i32 = arith.constant 0 : i32
    %c0_i32_0 = arith.constant 0 : i32
    %c0_i32_1 = arith.constant 0 : i32
    return %c0_i32, %c0_i32_0 : i32, i32
  }
  func.func @transform_3(%arg0: i32) -> (i32, i32) {
    %c0_i32 = arith.constant 0 : i32
    %c0_i32_0 = arith.constant 0 : i32
    return %arg0, %c0_i32 : i32, i32
  }
  func.func @transform_4(%arg0: i32) -> (i32, i32) {
    %c0_i32 = arith.constant 0 : i32
    %c0_i32_0 = arith.constant 0 : i32
    return %arg0, %c0_i32 : i32, i32
  }
}

</mosaic_0001>

<bundles_post_ra>
// kernel: tpu_custom_call.1
= control target key start
LH: loop header
LB: loop body
LE: loop exit
PB: predicated region body
PF: predicated region fallthrough
CT: control target
= control target key end

     0   :  { %10 = vsyncpa [#allocation3], 0  ;;  %vm24_vm0 = vcmask 261120   ;;  %s324_s0 = inlined_call_operand.vmem [shape: f32[16,32], index: 0, kind: input, shape index: {}]   ;;  %s325_s1 = inlined_call_operand.vmem [shape: f32[32,128], index: 1, kind: input, shape index: {}]   ;;  %s326_s2 = inlined_call_operand.vmem [shape: f32[128,32], index: 2, kind: input, shape index: {}]   ;;  %s327_s3 = inlined_call_operand.hbm [shape: f32[16,32], index: 3, kind: output, shape index: {0}]   ;;  %s328_s4 = inlined_call_operand.hbm [shape: f32[16,32], index: 4, kind: output, shape index: {1}]  }
   0x1   :  { %v23_v0 = vld [vmem:[%s325_s1 + $0x18] sm:$0xff]  ;;  %v22_v1 = vld [vmem:[%s325_s1 + $0x10] sm:$0xff]  ;;  %v21_v2 = vld [vmem:[%s325_s1 + $0x8] sm:$0xff] }
   0x2   :  { %43 = vmatpush.msra.mxu0 %v23_v0  ;;  %v71_v3 = vld [vmem:[%s326_s2 + $0x78] sm:$0xff]  ;;  %v70_v4 = vld [vmem:[%s326_s2 + $0x70] sm:$0xff]  ;;  %v20_v5 = vld [vmem:[%s325_s1] sm:$0xff] }
   0x3   :  { %72 = vmatpush.msra.mxu1 %v71_v3  ;;  %v69_v6 = vld [vmem:[%s326_s2 + $0x68] sm:$0xff]  ;;  %141 = vmatpush.msra.mxu2 %v71_v3  ;;  %v18_v7 = vld [vmem:[%s324_s0] sm:$0xff] }
   0x4   :  { %44 = vmatpush.msra.mxu0 %v22_v1  ;;  %v68_v8 = vld [vmem:[%s326_s2 + $0x60] sm:$0xff] }
   0x5   :  { %73 = vmatpush.msra.mxu1 %v70_v4  ;;  %142 = vmatpush.msra.mxu2 %v70_v4 }
   0x6   :  { %45 = vmatpush.msra.mxu0 %v21_v2 }
   0x7   :  { %11 = vsyncpa [#allocation5], 0  ;;  %74 = vmatpush.msra.mxu1 %v69_v6  ;;  %v67_v9 = vld [vmem:[%s326_s2 + $0x58] sm:$0xff]  ;;  %143 = vmatpush.msra.mxu2 %v69_v6  ;;  %v66_v10 = vld [vmem:[%s326_s2 + $0x50] sm:$0xff]  ;;  %s217_s5 = smov [#allocation4]   ;;  %s122_s7 = sshll.u32 %s328_s4, 4  ;;  %s123_s7 = int_to_ptr.hbm [resolvable:$true] %s122_s7 }
   0x8   :  { %46 = vmatpush.msra.mxu0 %v20_v5  ;;  %v65_v11 = vld [vmem:[%s326_s2 + $0x48] sm:$0xff]  ;;  %v64_v13 = vld [vmem:[%s326_s2 + $0x40] sm:$0xff]  ;;  %v63_v14 = vld [vmem:[%s326_s2 + $0x38] sm:$0xff]  ;;  %s218_s8 = smov [#allocation2]   ;;  %s109_s12 = sshll.u32 %s327_s3, 4  ;;  %s110_s12 = int_to_ptr.hbm [resolvable:$true] %s109_s12 }
   0x9   :  { %139 = vmatmul.msk.f32.vlgmr.msra.gmra.mxu0 %vm24_vm0, %v18_v7  ;;  %75 = vmatpush.msra.mxu1 %v68_v8  ;;  %v19_v12 = vld [vmem:[%s324_s0 + $0x8] sm:$0xff]  ;;  %v62_v15 = vld [vmem:[%s326_s2 + $0x30] sm:$0xff]  ;;  %v60_v17 = vld [vmem:[%s326_s2 + $0x20] sm:$0xff]  ;;  %s107_s9 = sshll.u32 %s218_s8, 4  ;;  %s219_s13 = smov 128   ;;  %s108_s9 = int_to_ptr.vmem [resolvable:$true] %s107_s9 }
   0xa   :  { %144 = vmatpush.msra.mxu2 %v68_v8  ;;  %v61_v16 = vld [vmem:[%s326_s2 + $0x28] sm:$0xff]  ;;  %v59_v18 = vld [vmem:[%s326_s2 + $0x18] sm:$0xff]  ;;  %v58_v19 = vld [vmem:[%s326_s2 + $0x10] sm:$0xff]  ;;  %s220_s14 = smov 8  }
   0xb   :  { %76 = vmatpush.msra.mxu1 %v67_v9  ;;  %v57_v20 = vld [vmem:[%s326_s2 + $0x8] sm:$0xff]  ;;  %v56_v21 = vld [vmem:[%s326_s2] sm:$0xff]  ;;  %s120_s2 = sshll.u32 %s217_s5, 4  ;;  %s121_s2 = int_to_ptr.vmem [resolvable:$true] %s120_s2 }
   0xc   :  { %145 = vmatpush.msra.mxu2 %v67_v9 }
   0xd   :  { %77 = vmatpush.msra.mxu1 %v66_v10 }
   0xe   :  { %146 = vmatpush.msra.mxu2 %v66_v10 }
   0xf   :  { %78 = vmatpush.msra.mxu1 %v65_v11 }
  0x10   :  { %147 = vmatpush.msra.mxu2 %v65_v11 }
  0x11   :  { %140 = vmatmul.msk.f32.gmra.mxu0 %vm24_vm0, %v19_v12  ;;  %79 = vmatpush.msra.mxu1 %v64_v13 }
  0x12   :  { %148 = vmatpush.msra.mxu2 %v64_v13 }
  0x13   :  { %80 = vmatpush.msra.mxu1 %v63_v14 }
  0x14   :  { %149 = vmatpush.msra.mxu2 %v63_v14 }
  0x15   :  { %81 = vmatpush.msra.mxu1 %v62_v15 }
  0x16   :  { %150 = vmatpush.msra.mxu2 %v62_v15 }
  0x17   :  { %82 = vmatpush.msra.mxu1 %v61_v16 }
  0x18   :  { %151 = vmatpush.msra.mxu2 %v61_v16 }
  0x19   :  { %83 = vmatpush.msra.mxu1 %v60_v17 }
  0x1a   :  { %152 = vmatpush.msra.mxu2 %v60_v17 }
  0x1b   :  { %84 = vmatpush.msra.mxu1 %v59_v18 }
  0x1c   :  { %153 = vmatpush.msra.mxu2 %v59_v18 }
  0x1d   :  { %85 = vmatpush.msra.mxu1 %v58_v19 }
  0x1e   :  { %154 = vmatpush.msra.mxu2 %v58_v19 }
  0x1f   :  { %86 = vmatpush.msra.mxu1 %v57_v20 }
  0x20   :  { %155 = vmatpush.msra.mxu2 %v57_v20 }
  0x21   :  { %87 = vmatpush.msra.mxu1 %v56_v21 }
  0x22   :  { %156 = vmatpush.msra.mxu2 %v56_v21 }
  0x86   :  { %v48_v22 = vpop.f32.mrf.mxu0 }
  0x87   :  { %v54_v23 = vmax.f32 %v48_v22, 0.0 }
  0x89   :  { %88 = vmatmul.f32.vlgmr.msra.gmra.mxu1 %v54_v23 }
  0x8e   :  { %v51_v24 = vpop.f32.mrf.mxu0 }
  0x8f   :  { %v55_v25 = vmax.f32 %v51_v24, 0.0 }
  0x91   :  { %91 = vmatmul.f32.vlgmr.msra.gmra.mxu2 %v55_v25 }
 0x106   :  { %v89_v26 = vpop.f32.mrf.mxu1 }
 0x107   :  { %161 = vtanh.f32 %v89_v26 }
 0x10d   :  { %v162_v27 = vpop.eup %161 }
 0x10e   :  { %v97_v28 = vmul.f32 %v162_v27, %v18_v7  ;;  %101 = vst.msk [vmem:[#allocation4] sm:$0xff] %vm24_vm0, %v162_v27 }
 0x110   :  { %99 = vst.msk [vmem:[#allocation2] sm:$0xff] %vm24_vm0, %v97_v28 }
 0x114   :  { %v92_v29 = vpop.f32.mrf.mxu2 }
 0x115   :  { %163 = vtanh.f32 %v92_v29 }
 0x11b   :  { %v164_v30 = vpop.eup %163 }
 0x11c   :  { %v98_v31 = vmul.f32 %v164_v30, %v19_v12  ;;  %102 = vst.msk [vmem:[#allocation4 + $0x8] sm:$0xff] %vm24_vm0, %v164_v30 }
 0x11d   :  { %128 = dma.vmem_to_hbm [thread:$0]  %s121_s2, 256, %s123_s7, [#allocation5], %s219_s13, %s219_s13, %s220_s14  }
 0x11e   :  { %100 = vst.msk [vmem:[#allocation2 + $0x8] sm:$0xff] %vm24_vm0, %v98_v31 }
 0x11f   :  { %115 = dma.vmem_to_hbm [thread:$0]  %s108_s9, 256, %s110_s12, [#allocation3], %s219_s13, %s219_s13, %s220_s14  }
 0x120   :  { %213 = dma.done.wait [#allocation3], 256  }
 0x121   :  { %214 = vsyncadd [#allocation3], 4294967040 }
 0x122   :  { %215 = dma.done.wait [#allocation5], 256  }
 0x123   :  { %216 = vsyncadd [#allocation5], 4294967040 }
 0x124   :  { %137 = vsyncpa [#allocation3], 1 }
 0x125   :  { %138 = vsyncpa [#allocation5], 1 }

</bundles_post_ra>
